<compile_context>
chip_gen: v7x
topology: tpu7x:2x2x1
jax: 0.10.0
libtpu: 0.0.40
codegen_flags: <defaults>
</compile_context>

<pallas_src>
import functools
import math

import jax
import jax.numpy as jnp
from jax.experimental import pallas as pl
from jax.experimental.pallas import tpu as pltpu

_LANES = 128
_SUBLANES = 8
# v7x-safe VMEM budget for the pipelined buffers (v7x TensorCore has 64 MiB).
_VMEM_BUDGET_BYTES = 40 * 1024 * 1024


def _round_up(x, m):
    return ((x + m - 1) // m) * m


def _linear_classifier_kernel(x_ref, w1_ref, b1_ref, w2_ref, b2_ref, o_ref, *,
                              negative_slope):
    # x_ref  : (Tm, Din)     row tile of flattened node features (pipelined)
    # w1_ref : (Din, Dhid)   fc1 weight, transposed to (in, out), resident
    # b1_ref : (1, Dhid)     f32
    # w2_ref : (Dhid, 128)   fc2 weight, transposed + zero-padded to 128 lanes
    # b2_ref : (1, 128)      f32, zero-padded
    # o_ref  : (Tm, 128)     lane-dense logits tile (cols >= Ncls are zero)
    h = jnp.dot(x_ref[...], w1_ref[...], preferred_element_type=jnp.float32)
    h = h + b1_ref[...]                                   # f32 bias, no cast
    h = jnp.where(h >= 0, h, negative_slope * h)          # LeakyReLU (VPU, f32)

    # fc2 — hidden never leaves VMEM.  When operands are bf16 the f32
    # accumulator is re-quantized to bf16 for the MXU (small, documented
    # divergence vs. a pure-f32 reference; use matmul_dtype=None for exact f32).
    out = jnp.dot(h.astype(w2_ref.dtype), w2_ref[...],
                  preferred_element_type=jnp.float32)
    out = out + b2_ref[...]                                # f32 bias, no cast
    o_ref[...] = out.astype(o_ref.dtype)


def linear_classifier_forward(node_feat, w1, b1, w2, b2, *,
                              negative_slope=0.01, block_rows=1024,
                              matmul_dtype=None):
    """Pallas equivalent of LinearClassifier.forward (inference path).

    node_feat    : (B, N, gnn_inp_dim)
    w1, b1       : fc1 params, PyTorch layout: (inp_dim, gnn_inp_dim), (inp_dim,)
    w2, b2       : fc2 params, PyTorch layout: (num_class, inp_dim), (num_class,)
    matmul_dtype : optional storage dtype for x / W1^T / W2^T (e.g. jnp.bfloat16
                   on v6e/v7x to halve HBM traffic); None -> input dtype.
    returns      : (s_logits (B, N-1, num_class), q_logits (B, num_class))
    """
    B, N, Din = node_feat.shape
    Dhid, Din_w = w1.shape
    Ncls, Dhid_w = w2.shape
    assert Din_w == Din and Dhid_w == Dhid
    assert b1.shape == (Dhid,) and b2.shape == (Ncls,)

    out_dtype = node_feat.dtype
    op_dtype = jnp.dtype(matmul_dtype) if matmul_dtype is not None else jnp.dtype(out_dtype)

    # fc2 is linear, so full-slab processing + a wrapper-side row split is
    # exactly equivalent to the PyTorch s_feat / q_feat split.
    M = B * N
    x = node_feat.reshape(M, Din).astype(op_dtype)

    # ---- Host-side one-time constant folds ---------------------------------
    n_out = _round_up(max(Ncls, 1), _LANES)          # lane-dense fc2 width
    w1t = w1.T.astype(op_dtype)                                      # (Din, Dhid)
    w2t = jnp.zeros((Dhid, n_out), op_dtype).at[:, :Ncls].set(w2.T.astype(op_dtype))
    b1r = b1.astype(jnp.float32).reshape(1, Dhid)
    b2r = jnp.zeros((1, n_out), jnp.float32).at[0, :Ncls].set(b2.astype(jnp.float32))

    # ---- Row-tile sizing against a v7x-safe VMEM budget --------------------
    in_b = op_dtype.itemsize
    out_b = jnp.dtype(out_dtype).itemsize
    # Double-buffered pipelined tiles (x in, logits out), bytes per tile row.
    per_row_bytes = 2 * (Din * in_b + n_out * out_b)
    # Resident operands (default BlockSpec double-buffers them too; for very
    # large Dhid on v7x, add pipeline_mode=pl.Buffered(1) to their specs to
    # single-buffer — negligible at this module's sizes).
    const_bytes = 2 * ((Din * Dhid + Dhid * n_out) * in_b + (Dhid + n_out) * 4)

    tm_cap = max(_SUBLANES,
                 ((_VMEM_BUDGET_BYTES - const_bytes) // max(per_row_bytes, 1))
                 // _SUBLANES * _SUBLANES)
    tm = min(_round_up(max(block_rows, _SUBLANES), _SUBLANES),
             _round_up(M, _SUBLANES),
             tm_cap)
    if M > _SUBLANES:
        # Keep >= 2 grid steps so ("parallel",) can use both v7x TensorCores.
        tm = min(tm, _round_up(pl.cdiv(M, 2), _SUBLANES))
    tm = max(tm, _SUBLANES)

    # Ragged edge tile is masked by Pallas — no host-side pad or [:M] slice.
    grid = (pl.cdiv(M, tm),)

    vmem_limit = int(min(64 * 1024 * 1024,
                         max(32 * 1024 * 1024,
                             tm * per_row_bytes + const_bytes + 4 * 1024 * 1024)))

    kernel = functools.partial(_linear_classifier_kernel,
                               negative_slope=negative_slope)

    logits_pad = pl.pallas_call(
        kernel,
        out_shape=jax.ShapeDtypeStruct((M, n_out), out_dtype),
        grid_spec=pltpu.PrefetchScalarGridSpec(
            num_scalar_prefetch=0,
            grid=grid,
            in_specs=[
                pl.BlockSpec((tm, Din), lambda i: (i, 0)),       # x row tile
                pl.BlockSpec((Din, Dhid), lambda i: (0, 0)),     # W1^T (resident)
                pl.BlockSpec((1, Dhid), lambda i: (0, 0)),       # b1 (f32)
                pl.BlockSpec((Dhid, n_out), lambda i: (0, 0)),   # W2^T, lane-padded
                pl.BlockSpec((1, n_out), lambda i: (0, 0)),      # b2, lane-padded
            ],
            out_specs=pl.BlockSpec((tm, n_out), lambda i: (i, 0)),
        ),
        compiler_params=pltpu.CompilerParams(
            dimension_semantics=("parallel",),
            vmem_limit_bytes=vmem_limit),
    )(x, w1t, b1r, w2t, b2r)

    # Drop the zero-padded lanes, restore (B, N), split support / query rows.
    logits = logits_pad[:, :Ncls].reshape(B, N, Ncls)
    s_logits = logits[:, :-1, :]
    q_logits = logits[:, -1, :]
    return s_logits, q_logits


def linear_classifier_reference(node_feat, w1, b1, w2, b2, negative_slope=0.01):
    """Pure-JAX reference mirroring the PyTorch forward exactly (eval mode)."""
    h = node_feat @ w1.T + b1
    h = jnp.where(h >= 0, h, negative_slope * h)   # LeakyReLU(0.01)
    s_feat = h[:, :-1, :]
    q_feat = h[:, -1, :]
    return s_feat @ w2.T + b2, q_feat @ w2.T + b2


if __name__ == "__main__":
    GNN_INP_DIM, INP_DIM, NUM_CLASS = 32, 32, 2

    def make_inputs(key, B, N):
        k_x, k_w1, k_b1, k_w2, k_b2 = jax.random.split(key, 5)
        node_feat = jax.random.normal(k_x, (B, N, GNN_INP_DIM), dtype=jnp.float32)
        w1 = jax.random.normal(k_w1, (INP_DIM, GNN_INP_DIM), jnp.float32) / math.sqrt(GNN_INP_DIM)
        b1 = jax.random.normal(k_b1, (INP_DIM,), jnp.float32) * 0.1
        w2 = jax.random.normal(k_w2, (NUM_CLASS, INP_DIM), jnp.float32) / math.sqrt(INP_DIM)
        b2 = jax.random.normal(k_b2, (NUM_CLASS,), jnp.float32) * 0.1
        return node_feat, w1, b1, w2, b2

    key = jax.random.PRNGKey(0)
    k0, k1 = jax.random.split(key)

    # 1) Module-sized check: batch=2, 8 nodes (7 support + 1 query), exact f32.
    node_feat, w1, b1, w2, b2 = make_inputs(k0, 2, 8)
    s_out, q_out = linear_classifier_forward(node_feat, w1, b1, w2, b2)
    s_out = jax.block_until_ready(s_out)
    q_out = jax.block_until_ready(q_out)
    s_ref, q_ref = linear_classifier_reference(node_feat, w1, b1, w2, b2)
    assert s_out.shape == (2, 7, NUM_CLASS) and q_out.shape == (2, NUM_CLASS)
    assert jnp.allclose(s_out, s_ref, atol=1e-5, rtol=1e-5), "s_logits mismatch (f32)"
    assert jnp.allclose(q_out, q_ref, atol=1e-5, rtol=1e-5), "q_logits mismatch (f32)"

    # 2) Multi-tile + ragged-edge check (M = 3*45 = 135 rows, >1 grid step).
    node_feat2, w1b, b1b, w2b, b2b = make_inputs(k1, 3, 45)
    s2, q2 = linear_classifier_forward(node_feat2, w1b, b1b, w2b, b2b, block_rows=64)
    s2 = jax.block_until_ready(s2)
    q2 = jax.block_until_ready(q2)
    s2_ref, q2_ref = linear_classifier_reference(node_feat2, w1b, b1b, w2b, b2b)
    assert jnp.allclose(s2, s2_ref, atol=1e-5, rtol=1e-5), "s_logits mismatch (ragged)"
    assert jnp.allclose(q2, q2_ref, atol=1e-5, rtol=1e-5), "q_logits mismatch (ragged)"

    # 3) bf16 operand-storage path (v6e/v7x HBM-traffic optimization), loose tol.
    s3, q3 = linear_classifier_forward(node_feat2, w1b, b1b, w2b, b2b,
                                       matmul_dtype=jnp.bfloat16)
    s3 = jax.block_until_ready(s3)
    q3 = jax.block_until_ready(q3)
    assert jnp.allclose(s3, s2_ref, atol=1e-1, rtol=1e-1), "s_logits mismatch (bf16)"
    assert jnp.allclose(q3, q2_ref, atol=1e-1, rtol=1e-1), "q_logits mismatch (bf16)"

    print("KERNEL_OK")
</pallas_src>

<mosaic_0001>
module attributes {stable_mosaic.version = 11 : i64} {
  func.func @_linear_classifier_kernel(%arg0: i32, %arg1: memref<8x32xf32, #tpu.memory_space<vmem>>, %arg2: memref<32x32xf32, #tpu.memory_space<vmem>>, %arg3: memref<1x32xf32, #tpu.memory_space<vmem>>, %arg4: memref<32x128xf32, #tpu.memory_space<vmem>>, %arg5: memref<1x128xf32, #tpu.memory_space<vmem>>, %arg6: memref<8x128xf32, #tpu.memory_space<vmem>>) attributes {dimension_semantics = [#tpu.dimension_semantics<parallel>], iteration_bounds = array<i64: 2>, scalar_prefetch = 0 : i64, scratch_operands = 0 : i64, tpu.core_type = #tpu.core_type<tc>, window_params = [{transform_indices = @transform_0, window_bounds = array<i64: 8, 32>}, {pipeline_mode = #tpu.pipeline_mode<synchronous>, transform_indices = @transform_1, window_bounds = array<i64: 32, 32>}, {pipeline_mode = #tpu.pipeline_mode<synchronous>, transform_indices = @transform_2, window_bounds = array<i64: 1, 32>}, {pipeline_mode = #tpu.pipeline_mode<synchronous>, transform_indices = @transform_3, window_bounds = array<i64: 32, 128>}, {pipeline_mode = #tpu.pipeline_mode<synchronous>, transform_indices = @transform_4, window_bounds = array<i64: 1, 128>}, {transform_indices = @transform_5, window_bounds = array<i64: 8, 128>}]} {
    %c0 = arith.constant 0 : index
    %c0_0 = arith.constant 0 : index
    %0 = vector.load %arg1[%c0, %c0_0] : memref<8x32xf32, #tpu.memory_space<vmem>>, vector<8x32xf32>
    %c0_1 = arith.constant 0 : index
    %c0_2 = arith.constant 0 : index
    %1 = vector.load %arg2[%c0_1, %c0_2] : memref<32x32xf32, #tpu.memory_space<vmem>>, vector<32x32xf32>
    %cst = arith.constant dense<0.000000e+00> : vector<8x32xf32>
    %2 = tpu.matmul %0, %1, %cst {dimension_numbers = #tpu.dot_dimension_numbers<[1], [0], [0], [1], [0, 0, 1, 1], [], []>} : vector<8x32xf32>, vector<32x32xf32>, vector<8x32xf32> -> vector<8x32xf32>
    %c0_3 = arith.constant 0 : index
    %c0_4 = arith.constant 0 : index
    %3 = vector.load %arg3[%c0_3, %c0_4] : memref<1x32xf32, #tpu.memory_space<vmem>>, vector<1x32xf32>
    %4 = vector.broadcast %3 : vector<1x32xf32> to vector<8x32xf32>
    %5 = arith.addf %2, %4 : vector<8x32xf32>
    %cst_5 = arith.constant 0.000000e+00 : f32
    %6 = vector.broadcast %cst_5 : f32 to vector<8x32xf32>
    %7 = arith.cmpf oge, %5, %6 : vector<8x32xf32>
    %cst_6 = arith.constant 0.00999999977 : f32
    %8 = vector.broadcast %cst_6 : f32 to vector<8x32xf32>
    %9 = arith.mulf %8, %5 : vector<8x32xf32>
    %10 = arith.select %7, %5, %9 : vector<8x32xi1>, vector<8x32xf32>
    %c0_7 = arith.constant 0 : index
    %c0_8 = arith.constant 0 : index
    %11 = vector.load %arg4[%c0_7, %c0_8] : memref<32x128xf32, #tpu.memory_space<vmem>>, vector<32x128xf32>
    %cst_9 = arith.constant dense<0.000000e+00> : vector<8x128xf32>
    %12 = tpu.matmul %10, %11, %cst_9 {dimension_numbers = #tpu.dot_dimension_numbers<[1], [0], [0], [1], [0, 0, 1, 1], [], []>} : vector<8x32xf32>, vector<32x128xf32>, vector<8x128xf32> -> vector<8x128xf32>
    %c0_10 = arith.constant 0 : index
    %c0_11 = arith.constant 0 : index
    %13 = vector.load %arg5[%c0_10, %c0_11] : memref<1x128xf32, #tpu.memory_space<vmem>>, vector<1x128xf32>
    %14 = vector.broadcast %13 : vector<1x128xf32> to vector<8x128xf32>
    %15 = arith.addf %12, %14 : vector<8x128xf32>
    %c0_12 = arith.constant 0 : index
    %c0_13 = arith.constant 0 : index
    %16 = vector.load %arg6[%c0_12, %c0_13] : memref<8x128xf32, #tpu.memory_space<vmem>>, vector<8x128xf32>
    tpu.vector_store %arg6[%c0_12, %c0_13], %15 {strides = array<i32>} : memref<8x128xf32, #tpu.memory_space<vmem>>, vector<8x128xf32>,
    return
  }
  func.func @transform_0(%arg0: i32) -> (i32, i32) {
    %c0_i32 = arith.constant 0 : i32
    %c0_i32_0 = arith.constant 0 : i32
    return %arg0, %c0_i32 : i32, i32
  }
  func.func @transform_1(%arg0: i32) -> (i32, i32) {
    %c0_i32 = arith.constant 0 : i32
    %c0_i32_0 = arith.constant 0 : i32
    %c0_i32_1 = arith.constant 0 : i32
    return %c0_i32, %c0_i32_0 : i32, i32
  }
  func.func @transform_2(%arg0: i32) -> (i32, i32) {
    %c0_i32 = arith.constant 0 : i32
    %c0_i32_0 = arith.constant 0 : i32
    %c0_i32_1 = arith.constant 0 : i32
    return %c0_i32, %c0_i32_0 : i32, i32
  }
  func.func @transform_3(%arg0: i32) -> (i32, i32) {
    %c0_i32 = arith.constant 0 : i32
    %c0_i32_0 = arith.constant 0 : i32
    %c0_i32_1 = arith.constant 0 : i32
    return %c0_i32, %c0_i32_0 : i32, i32
  }
  func.func @transform_4(%arg0: i32) -> (i32, i32) {
    %c0_i32 = arith.constant 0 : i32
    %c0_i32_0 = arith.constant 0 : i32
    %c0_i32_1 = arith.constant 0 : i32
    return %c0_i32, %c0_i32_0 : i32, i32
  }
  func.func @transform_5(%arg0: i32) -> (i32, i32) {
    %c0_i32 = arith.constant 0 : i32
    %c0_i32_0 = arith.constant 0 : i32
    return %arg0, %c0_i32 : i32, i32
  }
}

</mosaic_0001>

<bundles_post_ra>
// kernel: tpu_custom_call.1
= control target key start
LH: loop header
LB: loop body
LE: loop exit
PB: predicated region body
PF: predicated region fallthrough
CT: control target
= control target key end

     0   :  { %10 = vsyncpa [#allocation3], 0  ;;  %s1118_s0 = inlined_call_operand.hbm [shape: f32[16,32], index: 0, kind: input, shape index: {}]   ;;  %s1119_s1 = inlined_call_operand.hbm [shape: f32[32,32], index: 1, kind: input, shape index: {}]   ;;  %s1120_s2 = inlined_call_operand.vmem [shape: f32[1,32], index: 2, kind: input, shape index: {}]   ;;  %s1121_s3 = inlined_call_operand.hbm [shape: f32[32,128], index: 3, kind: input, shape index: {}]   ;;  %s1122_s4 = inlined_call_operand.vmem [shape: f32[1,128], index: 4, kind: input, shape index: {}]   ;;  %s1123_s5 = inlined_call_operand.hbm [shape: f32[16,128], index: 5, kind: output, shape index: {}]  }
   0x1   :  { %12 = vsyncpa [#allocation3 + $0x1], 0 }
   0x2   :  { %13 = vsyncpa [#allocation6], 0 }
   0x3   :  { %14 = vsyncpa [#allocation4], 0 }
   0x4   :  { %16 = vsyncpa [#allocation4 + $0x1], 0  ;;  %s879_s18 = smov 0   ;;  %s881_s19 = smov 0  }
   0x5   :  { %s883_s20 = smov 0   ;;  %s885_s21 = smov 0  }
   0x6 LB: > { %s900_s22 = sadd.s32 4294967295, %s838_s21   ;;  %s546_s23 = sadd.s32 4294967294, %s838_s21   ;;  %s838_s21 = sphi %s885_s21, %s1143_s21   ;;  %s834_s20 = sphi %s883_s20, %s1142_s20   ;;  %s830_s19 = sphi %s881_s19, %s1141_s19   ;;  %s826_s18 = sphi %s879_s18, %s1140_s18  }
   0x7   : > { %p42_p0 = scmp.ne.s32.totalorder %s830_s19, %s826_s18  ;;  %p1124_p1 = scmp.eq.s32.totalorder %s900_s22, 0 }
   0x8   : > { %p156_p3 = scmp.eq.s32.totalorder %s546_s23, 1  ;;  %p547_p5 = scmp.ge.s32.totalorder %s838_s21, 1 }
   0x9   : > { %p909_p4 = por %p1124_p1, %p42_p0  ;;  %p163_p7 = scmp.lt.s32.totalorder %s838_s21, 3 }
   0xa   : > { %p914_p6 = por %p156_p3, %p42_p0  ;;  %s840_s27 = smov [#allocation5]  }
   0xb   : > { %s1127_s24 = scalar_select %p909_p4, 1, 0 }
   0xc   : > { %s1128_s25 = scalar_select %p914_p6, 1, 0 }
   0xd   : > { %p919_p8 = pnand %p547_p5, %p163_p7  ;;  %s175_s28 = sshll.u32 %s840_s27, 4  ;;  %s923_s28 = int_to_ptr.vmem [resolvable:$true] %s175_s28 }
   0xe   : > { %s841_s30 = smov [#allocation7]   ;;  %s682_s9 = scalar_lea.hbm %s1119_s1, 512 }
   0xf   : > { %p622_p9 = pneg %p919_p8  ;;  %s191_s6 = sshll.u32 %s841_s30, 4  ;;  %s934_s6 = int_to_ptr.vmem [resolvable:$true] %s191_s6 }
  0x10   : > { %p683_p12 = scmp.ne.s32.totalorder %s1119_s1, %s682_s9  ;;  %p689_p5 = scmp.lt.u32.totalorder %s682_s9, %s1119_s1 }
  0x11   : > { %p930_p11 = pnand %p622_p9, %p1124_p1 }
  0x13   : > { %p684_p13 = pneg %p930_p11 }
  0x15   : > { %p685_p0 = pnand %p684_p13, %p683_p12 }
  0x17   : > { %p686_p3 = pneg %p685_p0 }
  0x19   : > { %p691_p7 = pnand %p689_p5, %p686_p3 }
  0x1b   : > { %694 = shalt.err (!%p691_p7)
}
  0x1c   : > { %s695_s14 = scalar_lea.vmem %s923_s28, 512  ;;  %p703_p2 = scmp.lt.s32.totalorder %s923_s28, %s923_s28 }
  0x1d   : > { %p696_p9 = scmp.ne.s32.totalorder %s923_s28, %s695_s14  ;;  %p704_p12 = scmp.lt.s32.totalorder %s695_s14, %s695_s14 }
  0x1f   : > { %p698_p10 = pnand %p696_p9, %p684_p13  ;;  %p705_p0 = por %p704_p12, %p703_p2 }
  0x21   : > { %p699_p1 = pneg %p698_p10 }
  0x23   : > { %p706_p6 = pnand %p705_p0, %p699_p1 }
  0x25   : > { %709 = shalt.err (!%p706_p6)
}
  0x26   : > { %s842_s15 = smov 128   ;;  %s843_s16 = smov 8  }
  0x27   : > { %625 = dma.hbm_to_vmem [thread:$0]  (!%p930_p11), %s1119_s1, 512, %s923_s28, [#allocation6], %s842_s15, %s842_s15, %s843_s16  }
  0x28   : > { %s710_s7 = scalar_lea.hbm %s1121_s3, 512 }
  0x29   : > { %p711_p2 = scmp.ne.s32.totalorder %s1121_s3, %s710_s7  ;;  %p717_p10 = scmp.lt.u32.totalorder %s710_s7, %s1121_s3 }
  0x2b   : > { %p713_p1 = pnand %p711_p2, %p684_p13 }
  0x2d   : > { %p714_p6 = pneg %p713_p1 }
  0x2f   : > { %p719_p3 = pnand %p717_p10, %p714_p6 }
  0x31   : > { %722 = shalt.err (!%p719_p3)
}
  0x32   : > { %s723_s28 = scalar_lea.vmem %s934_s6, 512  ;;  %p731_p12 = scmp.lt.s32.totalorder %s934_s6, %s934_s6 }
  0x33   : > { %p724_p5 = scmp.ne.s32.totalorder %s934_s6, %s723_s28  ;;  %p732_p0 = scmp.lt.s32.totalorder %s723_s28, %s723_s28 }
  0x35   : > { %p726_p7 = pnand %p724_p5, %p684_p13  ;;  %p733_p2 = por %p732_p0, %p731_p12 }
  0x37   : > { %p727_p9 = pneg %p726_p7 }
  0x39   : > { %p734_p1 = pnand %p733_p2, %p727_p9 }
  0x3b   : > { %737 = shalt.err (!%p734_p1)
}
  0x3c   : > { %628 = dma.hbm_to_vmem [thread:$0]  (!%p930_p11), %s1121_s3, 512, %s934_s6, [#allocation6], %s842_s15, %s842_s15, %s843_s16  }
  0x3d   : > { %s989_s14 = sadd.s32 1, %s838_s21   ;;  %s29_s29 = sadd.s32 1, %s834_s20 }
  0x3e   : > { %s26_s17 = ssub.s32 %s838_s21, %s989_s14  ;;  %p36_p13 = scmp.ne.s32.totalorder %s834_s20, %s830_s19 }
  0x3f   : > { %p27_p6 = scmp.eq.s32.totalorder %s26_s17, 0  ;;  %p37_p10 = scmp.eq.s32.totalorder %s838_s21, 0 }
  0x40   : > { %p1131_p3 = scmp.eq.s32.totalorder %s900_s22, 1  ;;  %p639_p7 = scmp.lt.s32.totalorder %s838_s21, 2 }
  0x41   : > { %s1005_s27 = scalar_select %p27_p6, %s834_s20, %s29_s29  }
  0x42   : > { %p999_p5 = por %p1131_p3, %p36_p13  ;;  %p38_p9 = por %p37_p10, %p36_p13 }
  0x43   : > { %s208_s30 = sand.u32 1, %s834_s20   ;;  %s552_s6 = sshll.u32 %s838_s21, 7 }
  0x44   : > { %s1132_s23 = scalar_select %p999_p5, 1, 0 }
  0x45   : > { %s551_s7 = sshll.u32 %s208_s30, 3  ;;  %s1012_s8 = scalar_lea.hbm %s1118_s0, %s552_s6 }
  0x46   : > { %s212_s9 = scalar_lea.vmem [#allocation2], %s551_s7  ;;  %p1016_p11 = pnand %p639_p7, %p38_p9 }
  0x47   : > { %s219_s10 = sshll.u32 %s212_s9, 4  ;;  %s209_s28 = scalar_lea.sflag [#allocation3], %s208_s30  ;;  %s1014_s10 = int_to_ptr.vmem [resolvable:$true] %s219_s10 }
  0x48   : > { %s738_s12 = scalar_lea.hbm %s1012_s8, 128  ;;  %p740_p0 = pneg %p1016_p11 }
  0x49   : > { %p739_p12 = scmp.ne.s32.totalorder %s1012_s8, %s738_s12  ;;  %s743_s17 = scalar_lea.hbm %s1118_s0, 256 }
  0x4a   : > { %p744_p13 = scmp.lt.u32.totalorder %s1012_s8, %s1118_s0  ;;  %p745_p6 = scmp.lt.u32.totalorder %s743_s17, %s738_s12 }
  0x4b   : > { %p741_p2 = pnand %p740_p0, %p739_p12  ;;  %p747_p3 = scmp.lt.u32.totalorder %s738_s12, %s1012_s8 }
  0x4c   : > { %p746_p10 = por %p745_p6, %p744_p13 }
  0x4d   : > { %p742_p1 = pneg %p741_p2 }
  0x4e   : > { %p748_p7 = por %p747_p3, %p746_p10 }
  0x50   : > { %p749_p9 = pnand %p748_p7, %p742_p1 }
  0x52   : > { %752 = shalt.err (!%p749_p9)
}
  0x53   : > { %s753_s30 = scalar_lea.vmem %s1014_s10, 128  ;;  %s844_s15 = smov [#allocation2]  }
  0x54   : > { %p754_p12 = scmp.ne.s32.totalorder %s1014_s10, %s753_s30  ;;  %s758_s16 = sshll.u32 %s844_s15, 4  ;;  %s759_s16 = int_to_ptr.vmem [resolvable:$false] %s758_s16 }
  0x55   : > { %s760_s9 = scalar_lea.vmem %s759_s16, 256  ;;  %p761_p4 = scmp.lt.s32.totalorder %s1014_s10, %s759_s16 }
  0x56   : > { %p756_p2 = pnand %p754_p12, %p740_p0  ;;  %p762_p13 = scmp.lt.s32.totalorder %s760_s9, %s753_s30 }
  0x58   : > { %p757_p5 = pneg %p756_p2  ;;  %p763_p6 = por %p762_p13, %p761_p4 }
  0x5a   : > { %p764_p10 = pnand %p763_p6, %p757_p5 }
  0x5c   : > { %767 = shalt.err (!%p764_p10)
}
  0x5d   : > { %632 = dma.hbm_to_vmem [thread:$0]  (!%p1016_p11), %s1012_s8, 128, %s1014_s10, %s209_s28  }
  0x5e   : > { %228 = sbr.rel (%p919_p8) target bundleno = 560 (0x230), region = 40  ;;  %s1048_s12 = sand.u32 (!%p919_p8), 1, %s830_s19  }
  0x5f   : > { %s554_s13 = sshll.u32 (!%p919_p8), %s1048_s12, 3  ;;  %s231_s29 = scalar_lea.sflag (!%p919_p8), [#allocation3], %s1048_s12 }
  0x60   : > { %s234_s17 = scalar_lea.vmem (!%p919_p8), [#allocation2], %s554_s13  ;;  %p1134_p4 = scmp.ne.s32.totalorder (!%p919_p8), %s1127_s24, 0 }
  0x65   : > { %813 = dma.done.wait (%p1134_p4), %s231_s29, 128  }
  0x66   : > { %815 = vsyncadd (%p1134_p4), %s231_s29, 4294967168  ;;  %p1135_p5 = scmp.eq.s32.totalorder %s900_s22, 0 }
  0x68   : > { %817 = dma.done.wait (%p1135_p5), [#allocation6], 1024   ;;  %p1136_p8 = pmov %p1135_p5 }
  0x69   : > { %v845_v0 = vmov 0.0|0.0   ;;  %vm846_vm0 = vmmov 0   ;;  %v847_v1 = vmov 0.0   ;;  %v270_v2 = vld [vmem:[#allocation5] sm:$0xff]  ;;  %v271_v3 = vld [vmem:[#allocation5 + $0x8] sm:$0xff]  ;;  %v272_v4 = vld [vmem:[#allocation5 + $0x10] sm:$0xff] }
  0x6a   : > { %819 = vsyncadd (%p1136_p8), [#allocation6], 4294966272  ;;  %598 = vmatprep.subr.bf16.mxu0 %v845_v0  ;;  %584 = vmatprep.mubr.msk.f32.mxu0 %vm846_vm0, %v847_v1  ;;  %v599_v5 = vpack.c.bf16 %v271_v3, %v270_v2  ;;  %v273_v6 = vld [vmem:[#allocation5 + $0x18] sm:$0xff]  ;;  %v358_v7 = vld [vmem:[#allocation7] sm:$0xff]  ;;  %vm281_vm1 = vcmask 261120   ;;  %s563_s11 = sshll.u32 %s900_s22, 7 }
  0x6b   : > { %604 = vmatprep.subr.bf16.mxu1 %v845_v0  ;;  %595 = vmatprep.mubr.msk.f32.mxu1 %vm846_vm0, %v847_v1  ;;  %v359_v8 = vld [vmem:[#allocation7 + $0x8] sm:$0xff]  ;;  %v602_v9 = vpack.c.bf16 %v273_v6, %v272_v4  ;;  %v269_v11 = vld [vmem:[%s234_s17] sm:$0xff]  ;;  %s268_s28 = scalar_lea.vmem [#allocation8], %s554_s13  ;;  %s1074_s15 = scalar_lea.hbm %s1123_s5, %s563_s11 }
  0x6c   : > { %600 = vmatpush3.bf16.msra.mxu0 %v599_v5  ;;  %v605_v10 = vpack.c.bf16 %v359_v8, %v358_v7  ;;  %v360_v12 = vld [vmem:[#allocation7 + $0x10] sm:$0xff]  ;;  %v361_v13 = vld [vmem:[#allocation7 + $0x18] sm:$0xff]  ;;  %s457_s7 = sshll.u32 %s268_s28, 4  ;;  %s444_s16 = scalar_lea.sflag [#allocation4], %s1048_s12  ;;  %s1076_s7 = int_to_ptr.vmem [resolvable:$true] %s457_s7 }
  0x6d   : > { %601 = vmatprep.subr.bf16.mxu0 %v845_v0  ;;  %v608_v14 = vpack.c.bf16 %v361_v13, %v360_v12  ;;  %v558_v15 = vld [vmem:[%s1120_s2] ss:$0 sm:$0xff]  ;;  %s768_s9 = scalar_lea.vmem %s1076_s7, 128  ;;  %p1137_p0 = scmp.ne.s32.totalorder %s1132_s23, 0 }
  0x6e   : > { %606 = vmatpush3.bf16.msra.mxu1 %v605_v10  ;;  %v560_v21 = vld [vmem:[%s1122_s4] ss:$0 sm:$0xff]  ;;  %p769_p11 = scmp.ne.s32.totalorder %s1076_s7, %s768_s9  ;;  %s848_s22 = smov [#allocation8]  }
  0x6f   : > { %607 = vmatprep.subr.bf16.mxu1 %v845_v0  ;;  %s772_s13 = sshll.u32 %s848_s22, 4  ;;  %s773_s13 = int_to_ptr.vmem [resolvable:$false] %s772_s13 }
  0x70   : > { %603 = vmatpush3.bf16.msra.mxu0 %v602_v9  ;;  %p770_p1 = pnand %p769_p11, %p1137_p0  ;;  %s774_s29 = scalar_lea.vmem %s773_s13, 256 }
  0x71   : > { %p775_p7 = scmp.lt.s32.totalorder %s1076_s7, %s773_s13  ;;  %p776_p9 = scmp.lt.s32.totalorder %s774_s29, %s768_s9 }
  0x72   : > { %609 = vmatpush3.bf16.msra.mxu1 %v608_v14  ;;  %p771_p3 = pneg %p770_p1 }
  0x73   : > { %585 = vmatmul.mubr.msk.f32.vlgmr.msra.gmra.mrb[0].mxu0 %vm281_vm1, %v269_v11  ;;  %p777_p12 = por %p776_p9, %p775_p7 }
  0x75   : > { %p778_p2 = pnand %p777_p12, %p771_p3 }
 0x146   : > { %v351_v16 = vpop.f32.mrb[0].mxu0 }
 0x147   : > { %v352_v17 = vadd.f32 %v558_v15, %v351_v16  ;;  %v586_v18 = vpop.f32.mrb[1].mxu0 }
 0x149   : > { %vm355_vm2 = vcmp.ge.f32.partialorder %v352_v17, 0.0  ;;  %v356_v19 = vmul.f32 0.01, %v352_v17 }
 0x14b   : > { %v357_v20 = vsel %vm355_vm2, %v352_v17, %v356_v19 }
 0x14c   : > { %596 = vmatmul.mubr.msk.f32.vlgmr.msra.gmra.mrb[0].mxu1 %vm281_vm1, %v357_v20 }
 0x21f   : > { %v438_v22 = vpop.f32.mrb[0].mxu1 }
 0x220   : > { %v439_v23 = vadd.f32 %v560_v21, %v438_v22  ;;  %v597_v24 = vpop.f32.mrb[1].mxu1 }
 0x222   : > { %442 = vst [vmem:[%s268_s28] sm:$0xff] %v439_v23 }
 0x223   : > { %781 = shalt.err (!%p778_p2)
}
 0x224   : > { %s782_s12 = scalar_lea.hbm %s1074_s15, 128  ;;  %s786_s26 = scalar_lea.hbm %s1123_s5, 256 }
 0x225   : > { %p783_p13 = scmp.ne.s32.totalorder %s1074_s15, %s782_s12  ;;  %p787_p4 = scmp.lt.u32.totalorder %s1074_s15, %s1123_s5 }
 0x226   : > { %p788_p5 = scmp.lt.u32.totalorder %s786_s26, %s782_s12  ;;  %p790_p11 = scmp.lt.u32.totalorder %s782_s12, %s1074_s15 }
 0x227   : > { %p784_p6 = pnand %p783_p13, %p1137_p0 }
 0x228   : > { %p789_p8 = por %p788_p5, %p787_p4 }
 0x229   : > { %p785_p10 = pneg %p784_p6 }
 0x22a   : > { %p791_p1 = por %p790_p11, %p789_p8 }
 0x22c   : > { %p792_p3 = pnand %p791_p1, %p785_p10 }
 0x22e   : > { %795 = shalt.err (!%p792_p3)
}
 0x22f   : > { %620 = dma.vmem_to_hbm [thread:$0]  (%p1137_p0), %s1076_s7, 128, %s1074_s15, %s444_s16  }
 0x230 PF: > { %s469_s11 = sand.u32 1, %s826_s18   ;;  %p1138_p7 = scmp.ne.s32.totalorder %s1128_s25, 0 }
 0x231   : > { %p1139_p9 = scmp.ge.s32.totalorder %s838_s21, 2  ;;  %s470_s28 = scalar_lea.sflag [#allocation4], %s469_s11 }
 0x233   : > { %p634_p12 = pnand %p1139_p9, %p1138_p7 }
 0x235   : > { %821 = dma.done.wait (!%p634_p12), %s470_s28, 128  }
 0x236   : > { %823 = vsyncadd (!%p634_p12), %s470_s28, 4294967168  ;;  %p19_p2 = scmp.ge.s32.totalorder %s989_s14, 4   ;;  %s1140_s18 = smov %s830_s19 }
 0x237   : > { %s1141_s19 = smov %s834_s20  ;;  %s1142_s20 = smov %s1005_s27 }
 0x238   : > { %s1143_s21 = smov %s989_s14  ;;  %21 = sbr.rel (!%p19_p2) target bundleno = 6 (0x6), region = 93 }
 0x23f   :  { %475 = vsyncpa [#allocation3], 1 }
 0x240   :  { %477 = vsyncpa [#allocation3 + $0x1], 1 }
 0x241   :  { %478 = vsyncpa [#allocation6], 1 }
 0x242   :  { %479 = vsyncpa [#allocation4], 1 }
 0x243   :  { %481 = vsyncpa [#allocation4 + $0x1], 1 }

</bundles_post_ra>
